<compile_context>
chip_gen: v7x
topology: tpu7x:2x2x1
jax: 0.10.0
libtpu: 0.0.40
codegen_flags: <defaults>
</compile_context>

<pallas_src>
import jax
import jax.numpy as jnp
from jax import lax
from jax.experimental import pallas as pl
from jax.experimental.pallas import tpu as pltpu


def _feature_agg_kernel(x_ref, w1_ref, b1_ref, w2_ref, b2_ref, out_ref):
    """One batch tile of SimpleFeatureAggregationModule.forward.

    x_ref  : (bb, C, L)   input features (L on the lane axis)
    w1_ref : (H, C)       1x1 conv #1 weight with BatchNorm folded in (H = C // 2)
    b1_ref : (H, 1)       folded conv #1 + BN bias
    w2_ref : (H, 1)       1x1 conv #2 weight (single output channel)
    b2_ref : (1, 1)       conv #2 bias
    out_ref: (bb, 3C)     fused [max | avg | attn] features
    """
    bb, C, L = x_ref.shape
    H = w1_ref.shape[0]
    # Fixed small row-chunk: keeps vreg pressure and the weight broadcast tiny
    # regardless of how large the (DMA-sized) batch tile is.
    cb = 8 if bb % 8 == 0 else bb
    n_chunks = bb // cb
    inv_len = 1.0 / float(L)

    # Hoisted once per grid step (params are VMEM-resident via constant index maps).
    w1 = w1_ref[...]                                           # (H, C)
    w1c = jnp.broadcast_to(w1[None, :, :], (cb, H, C))         # (cb, H, C) -- chunk-sized
    b1 = b1_ref[...]                                           # (H, 1)
    w2 = w2_ref[...]                                           # (H, 1)
    b2 = b2_ref[...]                                           # (1, 1)

    def body(ci, carry):
        r0 = pl.multiple_of(ci * cb, cb)
        x = x_ref[pl.ds(r0, cb), :, :].astype(jnp.float32)     # (cb, C, L)

        # Global max / avg pooling == lane-axis reductions.
        max_f = jnp.max(x, axis=-1)                            # (cb, C)
        avg_f = jnp.sum(x, axis=-1) * inv_len                  # (cb, C)

        # Attention pooling: 1x1 conv (MXU) -> ReLU -> 1x1 conv -> sigmoid (EUP).
        h = jnp.einsum('bhc,bcl->bhl', w1c, x,
                       preferred_element_type=jnp.float32)     # (cb, H, L)
        h = jnp.maximum(h + b1[None, :, :], 0.0)               # folded bias + ReLU
        logits = jnp.sum(h * w2[None, :, :], axis=1)           # (cb, L)
        attn = jax.nn.sigmoid(logits + b2)                     # (cb, L)
        attn_f = jnp.sum(x * attn[:, None, :], axis=-1)        # (cb, C)

        row = pl.ds(r0, cb)
        out_ref[row, 0:C] = max_f.astype(out_ref.dtype)
        out_ref[row, C:2 * C] = avg_f.astype(out_ref.dtype)
        out_ref[row, 2 * C:3 * C] = attn_f.astype(out_ref.dtype)
        return carry

    lax.fori_loop(0, n_chunks, body, 0)


def fold_attention_params(w1, b1, gamma, beta, running_mean, running_var, eps=1e-5):
    """Fold eval-mode BatchNorm1d into the first 1x1 conv."""
    scale = gamma / jnp.sqrt(running_var + eps)                # (H,)
    w1_folded = w1 * scale[:, None]                            # (H, C)
    b1_folded = b1 * scale + (beta - running_mean * scale)     # (H,)
    return w1_folded, b1_folded


def _tpu_vmem_bytes():
    try:
        info = pltpu.get_tpu_info()
        v = getattr(info, "vmem_capacity_bytes", None)
        if v:
            return int(v)
    except Exception:
        pass
    return 64 * 1024 * 1024  # conservative (v7x-sized) default


def _num_tensorcores():
    try:
        kind = jax.devices()[0].device_kind.lower()
    except Exception:
        return 1
    return 2 if ("v7" in kind or "7x" in kind) else 1


def simple_feature_aggregation(x, w1_folded, b1_folded, w2, b2, *, batch_tile=None):
    """x: (B, C, L). Returns (B, 3C) = cat([max, avg, attn], axis=1)."""
    B, C, L = x.shape
    H = w1_folded.shape[0]
    out_dtype = x.dtype
    x_item = jnp.dtype(x.dtype).itemsize
    o_item = jnp.dtype(out_dtype).itemsize

    vmem_phys = _tpu_vmem_bytes()
    num_tc = _num_tensorcores()

    if batch_tile is None:
        # Largest batch tile whose double-buffered input + double-buffered output
        # + resident params fit roughly half of physical VMEM (generation-aware).
        budget = vmem_phys // 2
        per_row = 2 * C * L * x_item + 2 * 3 * C * o_item
        param_bytes = 8 * (H * C + 2 * H + 1) + (64 << 10)
        bb = max(8, (budget - param_bytes) // max(per_row, 1))
        if num_tc > 1 and B > 8:
            # >=2 grid steps only on 2-TC chips so both cores stream HBM concurrently.
            bb = min(bb, ((pl.cdiv(B, num_tc) + 7) // 8) * 8)
    else:
        bb = int(batch_tile)

    if B < 8:
        bb = B                        # single block; block dims equal full array dims
    else:
        bb = min(bb, B)
        bb = max(8, (bb // 8) * 8)    # multiple of 8 -> aligned chunk stores
    bb = int(bb)
    nb = int(pl.cdiv(B, bb))

    w1_2d = w1_folded.astype(jnp.float32).reshape(H, C)
    b1_2d = b1_folded.astype(jnp.float32).reshape(H, 1)
    w2_2d = jnp.asarray(w2, jnp.float32).reshape(H, 1)
    b2_2d = jnp.asarray(b2, jnp.float32).reshape(1, 1)

    vmem_limit = int(min(vmem_phys * 3 // 4, 112 * (1 << 20)))

    out = pl.pallas_call(
        _feature_agg_kernel,
        out_shape=jax.ShapeDtypeStruct((B, 3 * C), out_dtype),
        grid_spec=pltpu.PrefetchScalarGridSpec(
            num_scalar_prefetch=0,
            grid=(nb,),
            in_specs=[
                pl.BlockSpec((bb, C, L), lambda i: (i, 0, 0)),
                # Params: constant block index -> stay VMEM-resident across grid steps.
                pl.BlockSpec((H, C), lambda i: (0, 0)),
                pl.BlockSpec((H, 1), lambda i: (0, 0)),
                pl.BlockSpec((H, 1), lambda i: (0, 0)),
                pl.BlockSpec((1, 1), lambda i: (0, 0)),
            ],
            out_specs=pl.BlockSpec((bb, 3 * C), lambda i: (i, 0)),
        ),
        compiler_params=pltpu.CompilerParams(
            dimension_semantics=("parallel",),
            vmem_limit_bytes=vmem_limit,
        ),
    )(x, w1_2d, b1_2d, w2_2d, b2_2d)
    return out


if __name__ == "__main__":
    B, C, L = 2, 32, 64
    H = C // 2
    eps = 1e-5

    key = jax.random.PRNGKey(0)
    ks = jax.random.split(key, 8)
    x = jax.random.normal(ks[0], (B, C, L), dtype=jnp.float32)

    # Conv1d(C, C//2, 1) / BatchNorm1d(C//2) / Conv1d(C//2, 1, 1) parameters.
    w1 = 0.2 * jax.random.normal(ks[1], (H, C), dtype=jnp.float32)
    b1 = 0.1 * jax.random.normal(ks[2], (H,), dtype=jnp.float32)
    gamma = 1.0 + 0.1 * jax.random.normal(ks[3], (H,), dtype=jnp.float32)
    beta = 0.1 * jax.random.normal(ks[4], (H,), dtype=jnp.float32)
    running_mean = 0.1 * jax.random.normal(ks[5], (H,), dtype=jnp.float32)
    running_var = 0.5 + jnp.abs(jax.random.normal(ks[6], (H,), dtype=jnp.float32))
    w2 = 0.2 * jax.random.normal(ks[7], (H,), dtype=jnp.float32)
    b2 = jnp.float32(0.05)

    # TODO(synk): BatchNorm1d is applied in inference mode (running stats folded into the
    # conv); training-mode batch statistics are not computed in-kernel.
    w1f, b1f = fold_attention_params(w1, b1, gamma, beta, running_mean, running_var, eps)

    out = simple_feature_aggregation(x, w1f, b1f, w2, b2)
    out = jax.block_until_ready(out)

    # Pure-JAX reference (unfolded), matching the PyTorch forward in eval mode.
    max_feat = jnp.max(x, axis=-1)
    avg_feat = jnp.mean(x, axis=-1)
    h = jnp.einsum('hc,bcl->bhl', w1, x) + b1[None, :, None]
    h = (h - running_mean[None, :, None]) / jnp.sqrt(running_var[None, :, None] + eps)
    h = h * gamma[None, :, None] + beta[None, :, None]
    h = jnp.maximum(h, 0.0)
    logits = jnp.einsum('h,bhl->bl', w2, h) + b2
    attn = jax.nn.sigmoid(logits)
    attn_feat = jnp.sum(x * attn[:, None, :], axis=-1)
    ref = jnp.concatenate([max_feat, avg_feat, attn_feat], axis=1)

    assert out.shape == (B, 3 * C), out.shape
    assert jnp.allclose(out, ref, atol=2e-4, rtol=2e-4), float(jnp.max(jnp.abs(out - ref)))
    print("KERNEL_OK")
</pallas_src>

<mosaic_0001>
module attributes {stable_mosaic.version = 11 : i64} {
  func.func @_feature_agg_kernel(%arg0: i32, %arg1: memref<2x32x64xf32, #tpu.memory_space<vmem>>, %arg2: memref<16x32xf32, #tpu.memory_space<vmem>>, %arg3: memref<16x1xf32, #tpu.memory_space<vmem>>, %arg4: memref<16x1xf32, #tpu.memory_space<vmem>>, %arg5: memref<1x1xf32, #tpu.memory_space<vmem>>, %arg6: memref<2x96xf32, #tpu.memory_space<vmem>>) attributes {dimension_semantics = [#tpu.dimension_semantics<parallel>], iteration_bounds = array<i64: 1>, scalar_prefetch = 0 : i64, scratch_operands = 0 : i64, tpu.core_type = #tpu.core_type<tc>, window_params = [{transform_indices = @transform_0, window_bounds = array<i64: 2, 32, 64>}, {pipeline_mode = #tpu.pipeline_mode<synchronous>, transform_indices = @transform_1, window_bounds = array<i64: 16, 32>}, {pipeline_mode = #tpu.pipeline_mode<synchronous>, transform_indices = @transform_2, window_bounds = array<i64: 16, 1>}, {pipeline_mode = #tpu.pipeline_mode<synchronous>, transform_indices = @transform_3, window_bounds = array<i64: 16, 1>}, {pipeline_mode = #tpu.pipeline_mode<synchronous>, transform_indices = @transform_4, window_bounds = array<i64: 1, 1>}, {transform_indices = @transform_5, window_bounds = array<i64: 2, 96>}]} {
    %c0 = arith.constant 0 : index
    %c0_0 = arith.constant 0 : index
    %0 = vector.load %arg2[%c0, %c0_0] : memref<16x32xf32, #tpu.memory_space<vmem>>, vector<16x32xf32>
    %1 = vector.shape_cast %0 : vector<16x32xf32> to vector<1x16x32xf32>
    %2 = vector.shape_cast %1 : vector<1x16x32xf32> to vector<1x16x32xf32>
    %3 = vector.broadcast %2 : vector<1x16x32xf32> to vector<2x16x32xf32>
    %c0_1 = arith.constant 0 : index
    %c0_2 = arith.constant 0 : index
    %4 = vector.load %arg3[%c0_1, %c0_2] : memref<16x1xf32, #tpu.memory_space<vmem>>, vector<16x1xf32>
    %c0_3 = arith.constant 0 : index
    %c0_4 = arith.constant 0 : index
    %5 = vector.load %arg4[%c0_3, %c0_4] : memref<16x1xf32, #tpu.memory_space<vmem>>, vector<16x1xf32>
    %c0_5 = arith.constant 0 : index
    %c0_6 = arith.constant 0 : index
    %6 = vector.load %arg5[%c0_5, %c0_6] : memref<1x1xf32, #tpu.memory_space<vmem>>, vector<1x1xf32>
    %c0_i32 = arith.constant 0 : i32
    %c2_i32 = arith.constant 2 : i32
    %7 = arith.muli %c0_i32, %c2_i32 : i32
    %8 = tpu.assume_multiple %7, 2 : i32
    %9 = arith.index_cast %8 : i32 to index
    %c0_7 = arith.constant 0 : index
    %c0_8 = arith.constant 0 : index
    %10 = vector.load %arg1[%9, %c0_7, %c0_8] : memref<2x32x64xf32, #tpu.memory_space<vmem>>, vector<2x32x64xf32>
    %cst = arith.constant dense<0xFF800000> : vector<2x32xf32>
    %11 = vector.multi_reduction <maximumf>, %10, %cst [2] : vector<2x32x64xf32> to vector<2x32xf32>
    %cst_9 = arith.constant dense<0.000000e+00> : vector<2x32xf32>
    %12 = vector.multi_reduction <add>, %10, %cst_9 [2] : vector<2x32x64xf32> to vector<2x32xf32>
    %cst_10 = arith.constant 1.562500e-02 : f32
    %13 = vector.broadcast %cst_10 : f32 to vector<2x32xf32>
    %14 = arith.mulf %12, %13 : vector<2x32xf32>
    "tpu.trace_start"() <{level = 10 : i32, message = "bhc,bcl->bhl"}> : () -> ()
    %cst_11 = arith.constant dense<0.000000e+00> : vector<2x16x64xf32>
    %15 = tpu.matmul %3, %10, %cst_11 {dimension_numbers = #tpu.dot_dimension_numbers<[2], [1], [1], [2], [0, 0, 0, 1, 1, 2], [0], [0]>} : vector<2x16x32xf32>, vector<2x32x64xf32>, vector<2x16x64xf32> -> vector<2x16x64xf32>
    "tpu.trace_stop"() : () -> ()
    %16 = vector.shape_cast %4 : vector<16x1xf32> to vector<1x16x1xf32>
    %17 = vector.broadcast %16 : vector<1x16x1xf32> to vector<2x16x64xf32>
    %18 = arith.addf %15, %17 : vector<2x16x64xf32>
    %cst_12 = arith.constant 0.000000e+00 : f32
    %19 = vector.broadcast %cst_12 : f32 to vector<2x16x64xf32>
    %20 = arith.maximumf %18, %19 : vector<2x16x64xf32>
    %21 = vector.shape_cast %5 : vector<16x1xf32> to vector<1x16x1xf32>
    %22 = vector.broadcast %21 : vector<1x16x1xf32> to vector<2x16x64xf32>
    %23 = arith.mulf %20, %22 : vector<2x16x64xf32>
    %cst_13 = arith.constant dense<0.000000e+00> : vector<2x64xf32>
    %24 = vector.multi_reduction <add>, %23, %cst_13 [1] : vector<2x16x64xf32> to vector<2x64xf32>
    %25 = vector.broadcast %6 : vector<1x1xf32> to vector<2x64xf32>
    %26 = arith.addf %24, %25 : vector<2x64xf32>
    %27 = arith.negf %26 : vector<2x64xf32>
    %28 = math.exp %27 : vector<2x64xf32>
    %cst_14 = arith.constant 1.000000e+00 : f32
    %29 = vector.broadcast %cst_14 : f32 to vector<2x64xf32>
    %30 = arith.addf %29, %28 : vector<2x64xf32>
    %31 = arith.divf %29, %30 : vector<2x64xf32>
    %32 = vector.shape_cast %31 : vector<2x64xf32> to vector<2x1x64xf32>
    %33 = vector.broadcast %32 : vector<2x1x64xf32> to vector<2x32x64xf32>
    %34 = arith.mulf %10, %33 : vector<2x32x64xf32>
    %cst_15 = arith.constant dense<0.000000e+00> : vector<2x32xf32>
    %35 = vector.multi_reduction <add>, %34, %cst_15 [2] : vector<2x32x64xf32> to vector<2x32xf32>
    %36 = arith.index_cast %8 : i32 to index
    %c0_16 = arith.constant 0 : index
    %37 = vector.load %arg6[%36, %c0_16] : memref<2x96xf32, #tpu.memory_space<vmem>>, vector<2x32xf32>
    tpu.vector_store %arg6[%36, %c0_16], %11 {strides = array<i32>} : memref<2x96xf32, #tpu.memory_space<vmem>>, vector<2x32xf32>,
    %38 = arith.index_cast %8 : i32 to index
    %c32 = arith.constant 32 : index
    %39 = vector.load %arg6[%38, %c32] : memref<2x96xf32, #tpu.memory_space<vmem>>, vector<2x32xf32>
    tpu.vector_store %arg6[%38, %c32], %14 {strides = array<i32>} : memref<2x96xf32, #tpu.memory_space<vmem>>, vector<2x32xf32>,
    %40 = arith.index_cast %8 : i32 to index
    %c64 = arith.constant 64 : index
    %41 = vector.load %arg6[%40, %c64] : memref<2x96xf32, #tpu.memory_space<vmem>>, vector<2x32xf32>
    tpu.vector_store %arg6[%40, %c64], %35 {strides = array<i32>} : memref<2x96xf32, #tpu.memory_space<vmem>>, vector<2x32xf32>,
    %c1_i32 = arith.constant 1 : i32
    return
  }
  func.func @transform_0(%arg0: i32) -> (i32, i32, i32) {
    %c0_i32 = arith.constant 0 : i32
    %c0_i32_0 = arith.constant 0 : i32
    %c0_i32_1 = arith.constant 0 : i32
    return %arg0, %c0_i32, %c0_i32_0 : i32, i32, i32
  }
  func.func @transform_1(%arg0: i32) -> (i32, i32) {
    %c0_i32 = arith.constant 0 : i32
    %c0_i32_0 = arith.constant 0 : i32
    %c0_i32_1 = arith.constant 0 : i32
    return %c0_i32, %c0_i32_0 : i32, i32
  }
  func.func @transform_2(%arg0: i32) -> (i32, i32) {
    %c0_i32 = arith.constant 0 : i32
    %c0_i32_0 = arith.constant 0 : i32
    %c0_i32_1 = arith.constant 0 : i32
    return %c0_i32, %c0_i32_0 : i32, i32
  }
  func.func @transform_3(%arg0: i32) -> (i32, i32) {
    %c0_i32 = arith.constant 0 : i32
    %c0_i32_0 = arith.constant 0 : i32
    %c0_i32_1 = arith.constant 0 : i32
    return %c0_i32, %c0_i32_0 : i32, i32
  }
  func.func @transform_4(%arg0: i32) -> (i32, i32) {
    %c0_i32 = arith.constant 0 : i32
    %c0_i32_0 = arith.constant 0 : i32
    %c0_i32_1 = arith.constant 0 : i32
    return %c0_i32, %c0_i32_0 : i32, i32
  }
  func.func @transform_5(%arg0: i32) -> (i32, i32) {
    %c0_i32 = arith.constant 0 : i32
    %c0_i32_0 = arith.constant 0 : i32
    return %arg0, %c0_i32 : i32, i32
  }
}

</mosaic_0001>

<bundles_post_ra>
// kernel: tpu_custom_call.1
= control target key start
LH: loop header
LB: loop body
LE: loop exit
PB: predicated region body
PF: predicated region fallthrough
CT: control target
= control target key end

     0   :  { %s884_s0 = inlined_call_operand.hbm [shape: f32[2,32,64], index: 0, kind: input, shape index: {}]   ;;  %s885_s1 = inlined_call_operand.vmem [shape: f32[16,32], index: 1, kind: input, shape index: {}]   ;;  %s886_s2 = inlined_call_operand.vmem [shape: f32[16,1], index: 2, kind: input, shape index: {}]   ;;  %s887_s3 = inlined_call_operand.vmem [shape: f32[16,1], index: 3, kind: input, shape index: {}]   ;;  %s888_s4 = inlined_call_operand.<no memory space> [shape: f32[1,1], index: 4, kind: input, shape index: {}]   ;;  %s889_s5 = inlined_call_operand.hbm [shape: f32[2,96], index: 5, kind: output, shape index: {}]  }
   0x1   :  { %v10_v0 = vstv %s888_s4 }
   0x2   :  { %11 = vst [vmem:[#allocation2] sm:$0x1] %v10_v0 }
   0x3   :  { %12 = vsyncpa [#allocation4], 0 }
   0x4   :  { %13 = vsyncpa [#allocation5], 0  ;;  %s677_s20 = smov [#allocation3]   ;;  %s629_s24 = scalar_lea.hbm %s884_s0, 1024 }
   0x5   :  { %s19_s21 = sshll.u32 %s677_s20, 4  ;;  %p630_p0 = scmp.ne.s32.totalorder %s884_s0, %s629_s24  ;;  %s20_s21 = int_to_ptr.vmem [resolvable:$true] %s19_s21 }
   0x6   :  { %p633_p1 = scmp.lt.u32.totalorder %s629_s24, %s884_s0 }
   0x8   :  { %p635_p2 = pnand %p633_p1, %p630_p0 }
   0xa   :  { %638 = shalt.err (!%p635_p2)
}
   0xb   :  { %s639_s4 = scalar_lea.vmem %s20_s21, 1024  ;;  %p644_p4 = scmp.lt.s32.totalorder %s20_s21, %s20_s21 }
   0xc   :  { %p640_p3 = scmp.ne.s32.totalorder %s20_s21, %s639_s4  ;;  %p645_p5 = scmp.lt.s32.totalorder %s639_s4, %s639_s4 }
   0xe   :  { %p646_p6 = por %p645_p5, %p644_p4 }
  0x10   :  { %p647_p7 = pnand %p646_p6, %p640_p3 }
  0x12   :  { %650 = shalt.err (!%p647_p7)
}
  0x13   :  { %s678_s29 = smov 128   ;;  %s679_s30 = smov 8  }
  0x14   :  { %25 = dma.hbm_to_vmem [thread:$0]  %s884_s0, 1024, %s20_s21, [#allocation4], %s678_s29, %s678_s29, %s679_s30  }
  0x15   :  { %673 = dma.done.wait [#allocation4], 1024  }
  0x16   :  { %674 = vsyncadd [#allocation4], 4294966272  ;;  %v680_v1 = vmov 0   ;;  %v727_v2 = vld [vmem:[#allocation3] sm:$0xff]  ;;  %v729_v3 = vld [vmem:[#allocation3 + $0x8] sm:$0xff]  ;;  %vm121_vm0 = vcmask 261120  }
  0x17   :  { %619 = vset.pattern.permute.xlu0 %v680_v1  ;;  %620 = vset.pattern.permute.xlu1 %v680_v1  ;;  %v731_v4 = vld [vmem:[#allocation3 + $0x20] sm:$0xff]  ;;  %v598_v5 = vpack.c.bf16 %v729_v3, %v727_v2  ;;  %v735_v6 = vld [vmem:[#allocation3 + $0x28] sm:$0xff]  ;;  %v737_v7 = vld [vmem:[#allocation3 + $0x10] sm:$0xff]  ;;  %vm54_vm1 = vcmask 523264   ;;  %vm446_vm2 = vcmask 392512   ;;  %vm388_vm3 = vcmask 130112  }
  0x18   :  { %v739_v8 = vld [vmem:[#allocation3 + $0x18] sm:$0xff]  ;;  %v606_v9 = vpack.c.bf16 %v735_v6, %v731_v4  ;;  %v745_v11 = vld [vmem:[#allocation3 + $0x30] sm:$0xff]  ;;  %v38_v17 = vld [vmem:[%s885_s1 + $0x8] sm:$0xff]  ;;  %v82_v21 = vsel %vm54_vm1, %v729_v3, 0.0  ;;  %v79_v22 = vsel %vm54_vm1, %v727_v2, 0.0  ;;  %v94_v23 = vsel %vm54_vm1, %v735_v6, 0.0 }
  0x19   :  { %v602_v10 = vpack.c.bf16 %v739_v8, %v737_v7  ;;  %v747_v12 = vld [vmem:[#allocation3 + $0x38] sm:$0xff]  ;;  %599 = vmatprep.subr.bf16.mxu0 %v598_v5  ;;  %v40_v18 = vld [vmem:[%s886_s2 + $0x8] sm:$0xff]  ;;  %v91_v24 = vsel %vm54_vm1, %v731_v4, 0.0  ;;  %v58_v25 = vsel %vm54_vm1, %v729_v3, -inf  ;;  %v55_v26 = vsel %vm54_vm1, %v727_v2, -inf }
  0x1a   :  { %v37_v13 = vld [vmem:[%s885_s1] sm:$0xff]  ;;  %v610_v14 = vpack.c.bf16 %v747_v12, %v745_v11  ;;  %607 = vmatprep.subr.bf16.mxu1 %v606_v9  ;;  %601 = vmatpush3.bf16.msra.mxu0 %v598_v5  ;;  %v42_v19 = vld [vmem:[%s887_s3 + $0x8] sm:$0xff]  ;;  %v70_v27 = vsel %vm54_vm1, %v735_v6, -inf  ;;  %v67_v28 = vsel %vm54_vm1, %v731_v4, -inf  ;;  %v97_v29 = vsel %vm54_vm1, %v745_v11, 0.0  ;;  %s681_s1 = smov [#allocation6]  }
  0x1b   :  { %584 = vmatprep.mubr.msk.f32.mxu0 %vm121_vm0, %v37_v13  ;;  %v39_v15 = vld [vmem:[%s886_s2] sm:$0xff]  ;;  %609 = vmatpush3.bf16.msra.mxu1 %v606_v9  ;;  %v85_v30 = vsel %vm54_vm1, %v737_v7, 0.0  ;;  %v73_v31 = vsel %vm54_vm1, %v745_v11, -inf  ;;  %v61_v32 = vsel %vm54_vm1, %v737_v7, -inf  ;;  %v100_v33 = vsel %vm54_vm1, %v747_v12, 0.0  ;;  %s548_s2 = sshll.u32 %s681_s1, 4  ;;  %s549_s2 = int_to_ptr.vmem [resolvable:$true] %s548_s2 }
  0x1c   :  { %v41_v16 = vld [vmem:[%s887_s3] sm:$0xff]  ;;  %603 = vmatprep.subr.bf16.mxu0 %v602_v10  ;;  %611 = vmatprep.subr.bf16.mxu1 %v610_v14  ;;  %v88_v34 = vsel %vm54_vm1, %v739_v8, 0.0  ;;  %v76_v35 = vsel %vm54_vm1, %v747_v12, -inf  ;;  %v64_v36 = vsel %vm54_vm1, %v739_v8, -inf  ;;  %vm453_vm4 = vcmask 458112   ;;  %s651_s3 = scalar_lea.vmem %s549_s2, 32  ;;  %p656_p9 = scmp.lt.s32.totalorder %s549_s2, %s549_s2 }
  0x1d   :  { %595 = vmatprep.mubr.msk.f32.mxu1 %vm121_vm0, %v37_v13  ;;  %113 = vperm.xlu0 %619, %v39_v15   ;;  %v561_v20 = vld [vmem:[#allocation2] ss:$0 sm:$0xff]  ;;  %v377_v13 = vlaneseq  ;;  %vm395_vm5 = vcmask 195712   ;;  %vm460_vm6 = vcmask 523712   ;;  %vm402_vm7 = vcmask 261312   ;;  %p652_p8 = scmp.ne.s32.totalorder %s549_s2, %s651_s3  ;;  %p657_p10 = scmp.lt.s32.totalorder %s651_s3, %s651_s3 }
  0x1e   :  { %284 = vperm.xlu1 %620, %v41_v16   ;;  %605 = vmatpush3.bf16.msra.mxu0 %v602_v10  ;;  %vm423_vm8 = vcmask 1041409   ;;  %vm426_vm9 = vcmask 254976   ;;  %vm483_vm10 = vcmask 517376   ;;  %vm503_vm11 = vcmask 654912  }
  0x1f   :  { %613 = vmatpush3.bf16.msra.mxu1 %v610_v14  ;;  %vm510_vm12 = vcmask 720512   ;;  %vm517_vm13 = vcmask 786112   ;;  %vm540_vm14 = vcmask 779776   ;;  %p658_p11 = por %p657_p10, %p656_p9 }
  0x21   :  { %585 = vmatmul.mubr.msk.f32.vlgmr.msra.gmra.mrb[0].mxu0 %vm121_vm0, %v38_v17  ;;  %118 = vperm.xlu0 %619, %v40_v18   ;;  %p659_p12 = pnand %p658_p11, %p652_p8 }
  0x22   :  { %596 = vmatmul.mubr.msk.f32.vlgmr.msra.gmra.mrb[0].mxu1 %vm121_vm0, %v38_v17  ;;  %289 = vperm.xlu1 %620, %v42_v19  }
  0x25   :  { %320 = vperm.xlu0 %619, %v561_v20   ;;  %v809_v20 = vand.u32 127, %v377_v13 }
  0x44   :  { %83 = vadd.xlane.f32.xlu0 %v82_v21 }
  0x46   :  { %80 = vadd.xlane.f32.xlu1 %v79_v22 }
  0x48   :  { %92 = vadd.xlane.f32.xlu0 %v91_v24 }
  0x4a   :  { %95 = vadd.xlane.f32.xlu1 %v94_v23 }
  0x4c   :  { %56 = vmax.xlane.f32.xlu0 %v55_v26 }
  0x4e   :  { %59 = vmax.xlane.f32.xlu1 %v58_v25 }
  0x50   :  { %68 = vmax.xlane.f32.xlu0 %v67_v28  ;;  %v436_v28 = vadd.s32 4294967264, %v809_v20 }
  0x52   :  { %71 = vmax.xlane.f32.xlu1 %v70_v27  ;;  %v815_v27 = vshrl.u32 %v377_v13, 7 }
  0x54   :  { %86 = vadd.xlane.f32.xlu0 %v85_v30  ;;  %v441_v30 = vadd.s32 4294967256, %v809_v20 }
  0x56   :  { %98 = vadd.xlane.f32.xlu1 %v97_v29 }
  0x58   :  { %62 = vmax.xlane.f32.xlu0 %v61_v32 }
  0x5a   :  { %74 = vmax.xlane.f32.xlu1 %v73_v31 }
  0x5c   :  { %89 = vadd.xlane.f32.xlu0 %v88_v34 }
  0x5e   :  { %101 = vadd.xlane.f32.xlu1 %v100_v33 }
  0x60   :  { %65 = vmax.xlane.f32.xlu0 %v64_v36 }
  0x62   :  { %77 = vmax.xlane.f32.xlu1 %v76_v35  ;;  %v383_v35 = vadd.s32 4294967288, %v809_v20 }
  0x9c   :  { %v114_v37 = vpop.permute.xlu0 %113 }
  0x9d   :  { %v285_v38 = vpop.permute.xlu1 %284 }
  0xa0   :  { %v119_v39 = vpop.permute.xlu0 %118 }
  0xa1   :  { %v290_v50 = vpop.permute.xlu1 %289 }
  0xa4   :  { %v321_v52 = vpop.permute.xlu0 %320 }
  0xd1   :  { %v84_v0 = vpop.xlane.xlu0 %83 }
  0xd3   :  { %v81_v63 = vpop.xlane.xlu1 %80 }
  0xd5   :  { %v93_v17 = vpop.xlane.xlu0 %92 }
  0xd7   :  { %v96_v16 = vpop.xlane.xlu1 %95 }
  0xd9   :  { %v813_v24 = vpop.xlane.xlu0 %56 }
  0xdb   :  { %v811_v23 = vpop.xlane.xlu1 %59 }
  0xdd   :  { %v69_v33 = vpop.xlane.xlu0 %68 }
  0xdf   :  { %v72_v32 = vpop.xlane.xlu1 %71 }
  0xf4   :  { %v586_v40 = vpop.f32.mrb[0].mxu0 }
  0xf5   :  { %v200_v41 = vadd.f32 %v586_v40, %v119_v39  ;;  %v597_v42 = vpop.f32.mrb[0].mxu1  ;;  %v194_v43 = vpop.f32.mrb[1].mxu0  ;;  %v444_v40 = vsub.s32 %v441_v30, %v815_v27 }
  0xf6   :  { %v275_v44 = vadd.f32 %v597_v42, %v119_v39  ;;  %v195_v45 = vadd.f32 %v194_v43, %v114_v37  ;;  %v269_v46 = vpop.f32.mrb[1].mxu1  ;;  %v107_v42 = vmul.f32 0.015625, %v93_v17  ;;  %v103_v43 = vmul.f32 0.015625, %v81_v63 }
  0xf7   :  { %v279_v47 = vmax.f32 %v200_v41, 0.0  ;;  %v270_v48 = vadd.f32 %v269_v46, %v114_v37  ;;  %v439_v37 = vsub.s32 %v436_v28, %v815_v27  ;;  %v108_v41 = vmul.f32 0.015625, %v96_v16  ;;  %v87_v46 = vpop.xlane.xlu0 %86 }
  0xf8   :  { %v281_v49 = vmax.f32 %v275_v44, 0.0  ;;  %v278_v51 = vmax.f32 %v195_v45, 0.0  ;;  %v104_v44 = vmul.f32 0.015625, %v84_v0  ;;  %v99_v45 = vpop.xlane.xlu1 %98 }
  0xf9   :  { %v293_v53 = vmul.f32 %v290_v50, %v279_v47  ;;  %v280_v54 = vmax.f32 %v270_v48, 0.0  ;;  %v390_v47 = vadd.s32 4294967280, %v809_v20  ;;  %v386_v48 = vsub.s32 %v383_v35, %v815_v27 }
  0xfa   :  { %v295_v55 = vmul.f32 %v290_v50, %v281_v49  ;;  %v292_v56 = vmul.f32 %v285_v38, %v278_v51  ;;  %v381_v49 = vsub.s32 %v809_v20, %v815_v27  ;;  %v109_v51 = vmul.f32 0.015625, %v99_v45 }
  0xfb   :  { %v297_v57 = vsel %vm54_vm1, %v293_v53, 0.0  ;;  %v294_v58 = vmul.f32 %v285_v38, %v280_v54  ;;  %v448_v38 = vadd.s32 4294967248, %v809_v20  ;;  %v465_v53 = vrot.slane %v107_v42, %v439_v37 }
  0xfc   :  { %v306_v59 = vsel %vm54_vm1, %v295_v55, 0.0  ;;  %v296_v60 = vsel %vm54_vm1, %v292_v56, 0.0  ;;  %v105_v54 = vmul.f32 0.015625, %v87_v46  ;;  %v455_v55 = vadd.s32 4294967240, %v809_v20 }
  0xfd   :  { %v298_v61 = vadd.f32 %v297_v57, %v296_v60  ;;  %v305_v62 = vsel %vm54_vm1, %v294_v58, 0.0  ;;  %v451_v50 = vsub.s32 %v448_v38, %v815_v27  ;;  %v440_v56 = vrot.slane %v103_v43, %v439_v37  ;;  %v63_v60 = vpop.xlane.xlu0 %62 }
  0xfe   :  { %v307_v1 = vadd.f32 %v306_v59, %v305_v62  ;;  %v445_v57 = vrot.slane %v104_v44, %v444_v40  ;;  %v393_v58 = vsub.s32 %v390_v47, %v815_v27  ;;  %v75_v59 = vpop.xlane.xlu1 %74  ;;  %v411_v62 = vrot.slane %v72_v32, %v386_v48 }
  0xff   :  { %v299_v5 = vrot.slane %v298_v61, 4  ;;  %v407_v63 = vrot.slane %v69_v33, %v381_v49  ;;  %v387_v0 = vrot.slane %v811_v23, %v386_v48  ;;  %v458_v13 = vsub.s32 %v455_v55, %v815_v27 }
 0x100   :  { %v308_v9 = vrot.slane %v307_v1, 4 }
 0x101   :  { %v300_v10 = vadd.f32 %v299_v5, %v298_v61  ;;  %v397_v61 = vadd.s32 4294967272, %v809_v20  ;;  %v474_v5 = vrot.slane %v109_v51, %v451_v50  ;;  %v90_v17 = vpop.xlane.xlu0 %89 }
 0x102   :  { %v309_v14 = vadd.f32 %v308_v9, %v307_v1  ;;  %v382_v1 = vrot.slane %v813_v24, %v381_v49  ;;  %v102_v16 = vpop.xlane.xlu1 %101  ;;  %v106_v23 = vmul.f32 0.015625, %v90_v17 }
 0x103   :  { %v301_v15 = vrot.slane %v300_v10, 2 }
 0x104   :  { %v310_v18 = vrot.slane %v309_v14, 2  ;;  %v459_v32 = vrot.slane %v106_v23, %v458_v13 }
 0x105   :  { %v302_v19 = vadd.f32 %v301_v15, %v300_v10  ;;  %v452_v10 = vrot.slane %v105_v54, %v451_v50  ;;  %v416_v15 = vrot.slane %v75_v59, %v393_v58 }
 0x106   :  { %v311_v21 = vadd.f32 %v310_v18, %v309_v14  ;;  %v447_v14 = vsel %vm446_vm2, %v445_v57, %v440_v56  ;;  %v400_v18 = vsub.s32 %v397_v61, %v815_v27  ;;  %v78_v35 = vpop.xlane.xlu1 %77  ;;  %v493_v61 = vadd.s32 4294967232, %v809_v20 }
 0x107   :  { %v303_v22 = vrot.slane %v302_v19, 1  ;;  %v454_v30 = vsel %vm453_vm4, %v452_v10, %v447_v14 }
 0x108   :  { %v312_v25 = vrot.slane %v311_v21, 1  ;;  %v421_v38 = vrot.slane %v78_v35, %v400_v18 }
 0x109   :  { %v304_v26 = vadd.f32 %v303_v22, %v302_v19  ;;  %v412_v19 = vsel %vm388_vm3, %v411_v62, %v407_v63  ;;  %v110_v22 = vmul.f32 0.015625, %v102_v16  ;;  %v505_v62 = vadd.s32 4294967216, %v809_v20 }
 0x10a   :  { %v313_v29 = vadd.f32 %v312_v25, %v311_v21  ;;  %v394_v21 = vrot.slane %v63_v60, %v393_v58  ;;  %v389_v25 = vsel %vm388_vm3, %v387_v0, %v382_v1  ;;  %v498_v60 = vadd.s32 4294967224, %v809_v20 }
 0x10b   :  { %v323_v31 = vadd.f32 %v321_v52, %v304_v26  ;;  %v496_v1 = vsub.s32 %v493_v61, %v815_v27 }
 0x10c   :  { %v324_v34 = vadd.f32 %v321_v52, %v313_v29  ;;  %v469_v52 = vrot.slane %v108_v41, %v444_v40  ;;  %v396_v37 = vsel %vm395_vm5, %v394_v21, %v389_v25  ;;  %v461_v40 = vsel %vm460_vm6, %v459_v32, %v454_v30 }
 0x10d   :  { %v562_v36 = vmul.f32 -1.442695, %v323_v31  ;;  %v479_v31 = vrot.slane %v110_v22, %v458_v13  ;;  %v501_v0 = vsub.s32 %v498_v60, %v815_v27 }
 0x10e   :  { %v563_v39 = vmul.f32 -1.442695, %v324_v34  ;;  %v470_v9 = vsel %vm446_vm2, %v469_v52, %v465_v53  ;;  %v417_v34 = vsel %vm395_vm5, %v416_v15, %v412_v19 }
 0x10f   :  { %621 = vpow2.f32 %v562_v36  ;;  %v475_v26 = vsel %vm453_vm4, %v474_v5, %v470_v9  ;;  %v66_v36 = vpop.xlane.xlu0 %65  ;;  %v422_v42 = vsel %vm402_vm7, %v421_v38, %v417_v34  ;;  %v508_v5 = vsub.s32 %v505_v62, %v815_v27 }
 0x110   :  { %623 = vpow2.f32 %v563_v39  ;;  %v480_v39 = vsel %vm460_vm6, %v479_v31, %v475_v26  ;;  %v401_v41 = vrot.slane %v66_v36, %v400_v18 }
 0x111   :  { %v481_v45 = vsel %vm423_vm8, %v480_v39, %v461_v40 }
 0x112   :  { %v403_v43 = vsel %vm402_vm7, %v401_v41, %v396_v37 }
 0x113   :  { %v424_v44 = vsel %vm423_vm8, %v422_v42, %v403_v43 }
 0x114   :  { %427 = vst.msk [vmem:[#allocation6] sm:$0x3] %vm426_vm9, %v424_v44 }
 0x115   :  { %484 = vst.msk [vmem:[#allocation6] sm:$0x3] %vm483_vm10, %v481_v45 }
 0x119   :  { %v622_v24 = vpop.eup %621 }
 0x11a   :  { %v624_v28 = vpop.eup %623  ;;  %v331_v29 = vadd.f32 1.0, %v622_v24 }
 0x11b   :  { %v332_v33 = vadd.f32 1.0, %v624_v28 }
 0x11c   :  { %625 = vrcp.f32 %v331_v29 }
 0x11d   :  { %627 = vrcp.f32 %v332_v33 }
 0x126   :  { %v626_v46 = vpop.eup %625 }
 0x127   :  { %v628_v47 = vpop.eup %627  ;;  %v338_v48 = vmul.f32 %v626_v46, %v729_v3  ;;  %v337_v49 = vmul.f32 %v626_v46, %v727_v2  ;;  %v339_v3 = vmul.f32 %v626_v46, %v737_v7 }
 0x128   :  { %v342_v52 = vmul.f32 %v628_v47, %v735_v6  ;;  %v341_v53 = vmul.f32 %v628_v47, %v731_v4  ;;  %v343_v56 = vmul.f32 %v628_v47, %v745_v11  ;;  %v344_v6 = vmul.f32 %v628_v47, %v747_v12 }
 0x129   :  { %v348_v50 = vsel %vm54_vm1, %v338_v48, 0.0  ;;  %v345_v51 = vsel %vm54_vm1, %v337_v49, 0.0  ;;  %v351_v57 = vsel %vm54_vm1, %v339_v3, 0.0  ;;  %v340_v4 = vmul.f32 %v626_v46, %v739_v8 }
 0x12a   :  { %349 = vadd.xlane.f32.xlu1 %v348_v50  ;;  %346 = vadd.xlane.f32.xlu0 %v345_v51  ;;  %v360_v54 = vsel %vm54_vm1, %v342_v52, 0.0  ;;  %v357_v55 = vsel %vm54_vm1, %v341_v53, 0.0  ;;  %v363_v2 = vsel %vm54_vm1, %v343_v56, 0.0  ;;  %v366_v58 = vsel %vm54_vm1, %v344_v6, 0.0 }
 0x12b   :  { %v354_v59 = vsel %vm54_vm1, %v340_v4, 0.0  ;;  %v512_v8 = vadd.s32 4294967208, %v809_v20 }
 0x12d   :  { %v515_v13 = vsub.s32 %v512_v8, %v815_v27 }
 0x12e   :  { %361 = vadd.xlane.f32.xlu1 %v360_v54  ;;  %358 = vadd.xlane.f32.xlu0 %v357_v55 }
 0x132   :  { %364 = vadd.xlane.f32.xlu1 %v363_v2  ;;  %352 = vadd.xlane.f32.xlu0 %v351_v57 }
 0x136   :  { %367 = vadd.xlane.f32.xlu1 %v366_v58  ;;  %355 = vadd.xlane.f32.xlu0 %v354_v59 }
 0x1b7   :  { %v350_v11 = vpop.xlane.xlu1 %349  ;;  %v347_v7 = vpop.xlane.xlu0 %346 }
 0x1b8   :  { %v502_v14 = vrot.slane %v350_v11, %v501_v0  ;;  %v497_v15 = vrot.slane %v347_v7, %v496_v1 }
 0x1ba   :  { %v504_v22 = vsel %vm503_vm11, %v502_v14, %v497_v15 }
 0x1bb   :  { %v362_v63 = vpop.xlane.xlu1 %361  ;;  %v359_v12 = vpop.xlane.xlu0 %358 }
 0x1bc   :  { %v526_v16 = vrot.slane %v362_v63, %v501_v0  ;;  %v522_v17 = vrot.slane %v359_v12, %v496_v1 }
 0x1be   :  { %v527_v23 = vsel %vm503_vm11, %v526_v16, %v522_v17 }
 0x1bf   :  { %v365_v9 = vpop.xlane.xlu1 %364  ;;  %v353_v10 = vpop.xlane.xlu0 %352 }
 0x1c0   :  { %v531_v18 = vrot.slane %v365_v9, %v508_v5  ;;  %v509_v19 = vrot.slane %v353_v10, %v508_v5 }
 0x1c2   :  { %v532_v26 = vsel %vm510_vm12, %v531_v18, %v527_v23  ;;  %v511_v28 = vsel %vm510_vm12, %v509_v19, %v504_v22 }
 0x1c3   :  { %v368_v20 = vpop.xlane.xlu1 %367  ;;  %v356_v21 = vpop.xlane.xlu0 %355 }
 0x1c4   :  { %v536_v24 = vrot.slane %v368_v20, %v515_v13  ;;  %v516_v25 = vrot.slane %v356_v21, %v515_v13 }
 0x1c6   :  { %v537_v27 = vsel %vm517_vm13, %v536_v24, %v532_v26  ;;  %v518_v29 = vsel %vm517_vm13, %v516_v25, %v511_v28 }
 0x1c7   :  { %v538_v30 = vsel %vm423_vm8, %v537_v27, %v518_v29 }
 0x1c8   :  { %541 = vst.msk [vmem:[#allocation6] sm:$0x3] %vm540_vm14, %v538_v30 }
 0x1c9   :  { %662 = shalt.err (!%p659_p12)
}
 0x1ca   :  { %s663_s21 = scalar_lea.hbm %s889_s5, 32 }
 0x1cb   :  { %p664_p13 = scmp.ne.s32.totalorder %s889_s5, %s663_s21  ;;  %p667_p0 = scmp.lt.u32.totalorder %s663_s21, %s889_s5 }
 0x1cd   :  { %p669_p1 = pnand %p667_p0, %p664_p13 }
 0x1cf   :  { %672 = shalt.err (!%p669_p1)
}
 0x1d0   :  { %551 = dma.vmem_to_hbm [thread:$0]  %s549_s2, 32, %s889_s5, [#allocation5]  }
 0x1d1   :  { %675 = dma.done.wait [#allocation5], 32  }
 0x1d2   :  { %676 = vsyncadd [#allocation5], 4294967264 }
 0x1d3   :  { %555 = vsyncpa [#allocation4], 1 }
 0x1d4   :  { %556 = vsyncpa [#allocation5], 1 }

</bundles_post_ra>
